<compile_context>
chip_gen: v7x
topology: tpu7x:2x2x1
jax: 0.10.0
libtpu: 0.0.40
codegen_flags: <defaults>
</compile_context>

<pallas_src>
import jax
import jax.numpy as jnp
from jax.experimental import pallas as pl
from jax.experimental.pallas import tpu as pltpu


def _round_up(x, m):
    return (x + m - 1) // m * m


def _pad2d(a, rows, cols):
    return jnp.pad(a, ((0, rows - a.shape[0]), (0, cols - a.shape[1])))


# ----------------------------- Stage 1: messages ------------------------------

def _message_kernel(xs_ref, coeff_ref, bases_ref, m_ref):
    # xs_ref:    (TE, I)    bf16  gathered + target-sorted source features
    # coeff_ref: (TE, B)    f32   rbw[edge_type] * edge_weight (0 for padding rows)
    # bases_ref: (B, I, O)  bf16  basis matrices
    # m_ref:     (TE, O)    bf16  per-edge messages
    num_bases = bases_ref.shape[0]
    xs = xs_ref[...]
    # Per-base dots (B small & static) -> only a (TE, O) f32 temp is live.
    acc = coeff_ref[:, 0:1] * jnp.dot(xs, bases_ref[0],
                                      preferred_element_type=jnp.float32)
    for b in range(1, num_bases):
        acc = acc + coeff_ref[:, b:b + 1] * jnp.dot(
            xs, bases_ref[b], preferred_element_type=jnp.float32)
    m_ref[...] = acc.astype(m_ref.dtype)


# --------------------- Stage 2: fused self-loop + scatter ---------------------

def _scatter_kernel(step_tile_ref, step_blk_ref, do_init_ref, do_scat_ref,
                    tgt_ref, xn_ref, wself_ref, m_ref, out_ref):
    # prefetch (SMEM): step_tile/step_blk/do_init/do_scat, each (G,) int32
    # tgt_ref:   (1, TE)   int32  target node ids of this edge block (target-sorted)
    # xn_ref:    (TN, I)   bf16   keep-masked node features of this node tile
    # wself_ref: (I, O)    bf16   self-loop weight matrix
    # m_ref:     (TE, O)   bf16   per-edge messages of this edge block
    # out_ref:   (TN, O)   f32    output tile; resident accumulator
    s = pl.program_id(0)
    tn = out_ref.shape[0]
    te = m_ref.shape[0]

    # First visit of this node tile: write the self-loop term (keep mask already
    # folded into xn in the wrapper: keep*(x@W) == (keep*x)@W).
    @pl.when(do_init_ref[s] == 1)
    def _():
        out_ref[...] = jnp.dot(xn_ref[...], wself_ref[...],
                               preferred_element_type=jnp.float32)

    # Scatter-add this edge block's messages into the node tile via an
    # on-the-fly one-hot^T matmul (exact 0/1 values -> exact in bf16).
    @pl.when(do_scat_ref[s] == 1)
    def _():
        node_ids = step_tile_ref[s] * tn + jax.lax.broadcasted_iota(
            jnp.int32, (tn, te), 0)
        oh_t = (node_ids == tgt_ref[...]).astype(m_ref.dtype)        # (TN, TE)
        out_ref[...] += jnp.dot(oh_t, m_ref[...],
                                preferred_element_type=jnp.float32)


# ----------------------------------- wrapper ----------------------------------

def bases_decomposition_forward(x, bases, rbw, node_keep_mask, source, target,
                                edge_type, edge_weights=None, *,
                                node_tile=256, edge_tile=512,
                                compute_dtype=jnp.bfloat16):
    """BasesDecomposition.forward (memory_intense=True) via Pallas TPU kernels."""
    num_nodes, input_dim = x.shape
    num_bases, _, output_dim = bases.shape
    num_edges = source.shape[0]
    f32 = jnp.float32

    if node_keep_mask is None:
        node_keep_mask = jnp.ones((num_nodes,), dtype=bool)
    if edge_weights is None:
        edge_weights = jnp.ones((num_edges,), dtype=f32)

    # Static padded / tiled sizes: feature dims lane-dense (x128), tiles aligned.
    i_pad = _round_up(input_dim, 128)
    o_pad = _round_up(output_dim, 128)
    tn = min(node_tile, _round_up(num_nodes, 8))
    n_pad = _round_up(num_nodes, tn)
    te = min(edge_tile, max(128, _round_up(num_edges, 128)))   # guards num_edges == 0
    e_pad = max(te, _round_up(num_edges, te))
    n_tiles = n_pad // tn
    e_blocks = e_pad // te

    # Tiny parameter math in plain XLA.
    w_self = jnp.einsum('b,bio->io', rbw[-1].astype(f32), bases.astype(f32))

    # --- sort edges by target and gather per-edge operands in sorted order ---
    tgt_i = target.astype(jnp.int32)
    perm = jnp.argsort(tgt_i)
    tgt_s = tgt_i[perm]
    src_s = source.astype(jnp.int32)[perm]
    coeff_s = (rbw[edge_type.astype(jnp.int32)[perm]].astype(f32)
               * edge_weights.astype(f32)[perm][:, None])              # (E, B)
    # Pad targets with the last real target (keeps sorted order & block spans tight;
    # padded messages are zero so their scatter contribution is zero anyway).
    pad_tgt = tgt_s[-1] if num_edges > 0 else jnp.int32(0)
    tgt_full = jnp.full((e_pad,), pad_tgt, jnp.int32).at[:num_edges].set(tgt_s)

    # --- operand prep: pad + cast (keep mask folded into xn; no keep_ref input) ---
    xn = _pad2d((x * node_keep_mask[:, None].astype(x.dtype)).astype(f32),
                n_pad, i_pad).astype(compute_dtype)                     # (Np, Ip)
    wself = _pad2d(w_self, i_pad, o_pad).astype(compute_dtype)          # (Ip, Op)
    xs = _pad2d(x[src_s].astype(f32), e_pad, i_pad).astype(compute_dtype)  # (Ep, Ip)
    coeff = _pad2d(coeff_s, e_pad, num_bases)                           # (Ep, B)
    bases_p = jnp.pad(bases.astype(f32),
                      ((0, 0), (0, i_pad - input_dim),
                       (0, o_pad - output_dim))).astype(compute_dtype)  # (B, Ip, Op)

    # --- Stage 1: per-edge messages, computed exactly once, stored in bf16 ---
    msg_cost = pl.CostEstimate(
        flops=2 * e_pad * i_pad * num_bases * o_pad,
        transcendentals=0,
        bytes_accessed=(xs.size + bases_p.size + e_pad * o_pad) * 2 + coeff.size * 4)
    m = pl.pallas_call(
        _message_kernel,
        out_shape=jax.ShapeDtypeStruct((e_pad, o_pad), compute_dtype),
        grid_spec=pltpu.PrefetchScalarGridSpec(
            num_scalar_prefetch=0,
            grid=(e_blocks,),
            in_specs=[
                pl.BlockSpec((te, i_pad), lambda e: (e, 0)),                   # xs
                pl.BlockSpec((te, num_bases), lambda e: (e, 0)),               # coeff
                pl.BlockSpec((num_bases, i_pad, o_pad), lambda e: (0, 0, 0)),  # bases
            ],
            out_specs=pl.BlockSpec((te, o_pad), lambda e: (e, 0)),
        ),
        compiler_params=pltpu.CompilerParams(dimension_semantics=("parallel",)),
        cost_estimate=msg_cost,
    )(xs, coeff, bases_p)

    # --- build flattened (node_tile, edge_block) schedule for the scatter stage ---
    # Edge block b covers node tiles [lo[b], hi[b]] (targets are sorted & contiguous).
    tgt_blk = tgt_full.reshape(e_blocks, te)
    lo = tgt_blk[:, 0] // tn                                            # (Eb,)
    hi = tgt_blk[:, -1] // tn                                           # (Eb,)
    tiles = jnp.arange(n_tiles, dtype=jnp.int32)
    ov = (lo[None, :] <= tiles[:, None]) & (tiles[:, None] <= hi[None, :])
    covered = ov.any(axis=1)
    # Node tiles with no incoming edges still need one step for the self-loop term;
    # point them at the nearest block so consecutive steps reuse the same DMA.
    fill_b = jnp.clip(jnp.searchsorted(hi, tiles), 0, e_blocks - 1)
    ovp = ov.at[tiles, fill_b].set(ov[tiles, fill_b] | (~covered))
    flat = ovp.reshape(-1)                                              # (t, b) row-major
    # Static bound on real steps: sum_t max(1, overlaps_t) <= n_tiles + e_blocks - 1.
    num_steps = n_tiles + e_blocks
    idx = jnp.nonzero(flat, size=num_steps, fill_value=flat.shape[0] - 1)[0]
    valid = jnp.arange(num_steps) < jnp.sum(flat)
    step_tile = (idx // e_blocks).astype(jnp.int32)    # padded steps -> last tile (no
    step_blk = (idx % e_blocks).astype(jnp.int32)      # spurious output writeback)
    first = jnp.concatenate([jnp.ones((1,), bool), step_tile[1:] != step_tile[:-1]])
    do_init = (valid & first).astype(jnp.int32)
    do_scat = (valid & ov.reshape(-1)[idx]).astype(jnp.int32)

    tgt2d = tgt_full.reshape(1, e_pad)

    # --- Stage 2: fused self-loop + bucketed scatter-add (resident f32 output) ---
    scat_cost = pl.CostEstimate(
        flops=2 * n_pad * i_pad * o_pad + 2 * num_steps * tn * te * o_pad,
        transcendentals=0,
        bytes_accessed=((xn.size + wself.size) * 2
                        + num_steps * (te * o_pad * 2 + te * 4)
                        + n_pad * o_pad * 4))
    out_pad = pl.pallas_call(
        _scatter_kernel,
        out_shape=jax.ShapeDtypeStruct((n_pad, o_pad), jnp.float32),
        grid_spec=pltpu.PrefetchScalarGridSpec(
            num_scalar_prefetch=4,
            grid=(num_steps,),
            in_specs=[
                pl.BlockSpec((1, te), lambda s, st, sb, di, dc: (0, sb[s])),      # tgt
                pl.BlockSpec((tn, i_pad), lambda s, st, sb, di, dc: (st[s], 0)),  # xn
                pl.BlockSpec((i_pad, o_pad), lambda s, st, sb, di, dc: (0, 0)),   # wself
                pl.BlockSpec((te, o_pad), lambda s, st, sb, di, dc: (sb[s], 0)),  # m
            ],
            out_specs=pl.BlockSpec((tn, o_pad),
                                   lambda s, st, sb, di, dc: (st[s], 0)),
        ),
        compiler_params=pltpu.CompilerParams(dimension_semantics=("arbitrary",)),
        cost_estimate=scat_cost,
    )(step_tile, step_blk, do_init, do_scat, tgt2d, xn, wself, m)

    return out_pad[:num_nodes, :output_dim]


def reference_forward(x, bases, rbw, node_keep_mask, source, target, edge_type,
                      edge_weights):
    """Pure-JAX f32 replica of BasesDecomposition.forward (memory_intense=True)."""
    num_relations = rbw.shape[0] - 1
    w_self = jnp.einsum('b,bio->io', rbw[num_relations], bases)
    out = jnp.where(node_keep_mask[:, None], x @ w_self, 0.0)
    m = jnp.einsum('mi,mb,bio->mo', x[source], rbw[edge_type], bases)
    m = m * edge_weights[:, None]
    return out.at[target].add(m)


if __name__ == "__main__":
    # Small shapes, but chosen to exercise multiple node tiles and edge blocks.
    num_nodes = 200      # N  -> 2 node tiles at node_tile=128
    input_dim = 48       # I
    output_dim = 32      # O
    num_relations = 5    # R
    num_bases = 3        # B
    num_edges = 400      # E  -> 4 edge blocks at edge_tile=128

    key = jax.random.PRNGKey(0)
    k_x, k_b, k_w, k_s, k_t, k_e, k_ew, k_m = jax.random.split(key, 8)

    x = jax.random.normal(k_x, (num_nodes, input_dim), dtype=jnp.float32)

    # Parameters (mimicking reset_parameters()):
    xavier_std = (2.0 / (input_dim + output_dim)) ** 0.5
    bases = xavier_std * jax.random.normal(
        k_b, (num_bases, input_dim, output_dim), dtype=jnp.float32)
    rbw = jax.random.uniform(k_w, (num_relations + 1, num_bases), dtype=jnp.float32)
    rbw = rbw / jnp.sum(jnp.abs(rbw), axis=1, keepdims=True)

    source = jax.random.randint(k_s, (num_edges,), 0, num_nodes, dtype=jnp.int32)
    target = jax.random.randint(k_t, (num_edges,), 0, num_nodes, dtype=jnp.int32)
    edge_type = jax.random.randint(k_e, (num_edges,), 0, num_relations, dtype=jnp.int32)
    edge_weights = jax.random.uniform(
        k_ew, (num_edges,), dtype=jnp.float32, minval=0.5, maxval=1.5)
    node_keep_mask = jax.random.bernoulli(k_m, 0.8, (num_nodes,))

    out = bases_decomposition_forward(
        x, bases, rbw, node_keep_mask, source, target, edge_type, edge_weights,
        node_tile=128, edge_tile=128)
    out = jax.block_until_ready(out)

    ref = reference_forward(
        x, bases, rbw, node_keep_mask, source, target, edge_type, edge_weights)

    assert out.shape == (num_nodes, output_dim)
    assert out.dtype == jnp.float32
    # bf16 MXU inputs / bf16 messages with f32 accumulation -> loose tolerance vs f32 ref.
    if not jnp.allclose(out, ref, atol=5e-2, rtol=5e-2):
        max_err = float(jnp.max(jnp.abs(out - ref)))
        raise AssertionError(f"Pallas kernel output does not match reference "
                             f"(max abs err {max_err})")

    print("KERNEL_OK")
</pallas_src>

<mosaic_0001>
module attributes {stable_mosaic.version = 11 : i64} {
  func.func @_message_kernel(%arg0: i32, %arg1: memref<128x128xbf16, #tpu.memory_space<vmem>>, %arg2: memref<128x3xf32, #tpu.memory_space<vmem>>, %arg3: memref<3x128x128xbf16, #tpu.memory_space<vmem>>, %arg4: memref<128x128xbf16, #tpu.memory_space<vmem>>) attributes {dimension_semantics = [#tpu.dimension_semantics<parallel>], iteration_bounds = array<i64: 4>, scalar_prefetch = 0 : i64, scratch_operands = 0 : i64, tpu.core_type = #tpu.core_type<tc>, window_params = [{transform_indices = @transform_0, window_bounds = array<i64: 128, 128>}, {transform_indices = @transform_1, window_bounds = array<i64: 128, 3>}, {pipeline_mode = #tpu.pipeline_mode<synchronous>, transform_indices = @transform_2, window_bounds = array<i64: 3, 128, 128>}, {transform_indices = @transform_3, window_bounds = array<i64: 128, 128>}]} {
    %c0 = arith.constant 0 : index
    %c0_0 = arith.constant 0 : index
    %0 = vector.load %arg1[%c0, %c0_0] : memref<128x128xbf16, #tpu.memory_space<vmem>>, vector<128x128xbf16>
    %c0_1 = arith.constant 0 : index
    %c0_2 = arith.constant 0 : index
    %1 = vector.load %arg2[%c0_1, %c0_2] : memref<128x3xf32, #tpu.memory_space<vmem>>, vector<128x1xf32>
    %c0_3 = arith.constant 0 : index
    %c0_4 = arith.constant 0 : index
    %c0_5 = arith.constant 0 : index
    %2 = vector.load %arg3[%c0_3, %c0_4, %c0_5] : memref<3x128x128xbf16, #tpu.memory_space<vmem>>, vector<1x128x128xbf16>
    %3 = vector.shape_cast %2 : vector<1x128x128xbf16> to vector<128x128xbf16>
    %cst = arith.constant dense<0.000000e+00> : vector<128x128xf32>
    %4 = tpu.matmul %0, %3, %cst {dimension_numbers = #tpu.dot_dimension_numbers<[1], [0], [0], [1], [0, 0, 1, 1], [], []>} : vector<128x128xbf16>, vector<128x128xbf16>, vector<128x128xf32> -> vector<128x128xf32>
    %5 = vector.broadcast %1 : vector<128x1xf32> to vector<128x128xf32>
    %6 = arith.mulf %5, %4 : vector<128x128xf32>
    %c0_6 = arith.constant 0 : index
    %c1 = arith.constant 1 : index
    %7 = vector.load %arg2[%c0_6, %c1] : memref<128x3xf32, #tpu.memory_space<vmem>>, vector<128x1xf32>
    %c1_7 = arith.constant 1 : index
    %c0_8 = arith.constant 0 : index
    %c0_9 = arith.constant 0 : index
    %8 = vector.load %arg3[%c1_7, %c0_8, %c0_9] : memref<3x128x128xbf16, #tpu.memory_space<vmem>>, vector<1x128x128xbf16>
    %9 = vector.shape_cast %8 : vector<1x128x128xbf16> to vector<128x128xbf16>
    %cst_10 = arith.constant dense<0.000000e+00> : vector<128x128xf32>
    %10 = tpu.matmul %0, %9, %cst_10 {dimension_numbers = #tpu.dot_dimension_numbers<[1], [0], [0], [1], [0, 0, 1, 1], [], []>} : vector<128x128xbf16>, vector<128x128xbf16>, vector<128x128xf32> -> vector<128x128xf32>
    %11 = vector.broadcast %7 : vector<128x1xf32> to vector<128x128xf32>
    %12 = arith.mulf %11, %10 : vector<128x128xf32>
    %13 = arith.addf %6, %12 : vector<128x128xf32>
    %c0_11 = arith.constant 0 : index
    %c2 = arith.constant 2 : index
    %14 = vector.load %arg2[%c0_11, %c2] : memref<128x3xf32, #tpu.memory_space<vmem>>, vector<128x1xf32>
    %c2_12 = arith.constant 2 : index
    %c0_13 = arith.constant 0 : index
    %c0_14 = arith.constant 0 : index
    %15 = vector.load %arg3[%c2_12, %c0_13, %c0_14] : memref<3x128x128xbf16, #tpu.memory_space<vmem>>, vector<1x128x128xbf16>
    %16 = vector.shape_cast %15 : vector<1x128x128xbf16> to vector<128x128xbf16>
    %cst_15 = arith.constant dense<0.000000e+00> : vector<128x128xf32>
    %17 = tpu.matmul %0, %16, %cst_15 {dimension_numbers = #tpu.dot_dimension_numbers<[1], [0], [0], [1], [0, 0, 1, 1], [], []>} : vector<128x128xbf16>, vector<128x128xbf16>, vector<128x128xf32> -> vector<128x128xf32>
    %18 = vector.broadcast %14 : vector<128x1xf32> to vector<128x128xf32>
    %19 = arith.mulf %18, %17 : vector<128x128xf32>
    %20 = arith.addf %13, %19 : vector<128x128xf32>
    %21 = arith.truncf %20 : vector<128x128xf32> to vector<128x128xbf16>
    %c0_16 = arith.constant 0 : index
    %c0_17 = arith.constant 0 : index
    %22 = vector.load %arg4[%c0_16, %c0_17] : memref<128x128xbf16, #tpu.memory_space<vmem>>, vector<128x128xbf16>
    tpu.vector_store %arg4[%c0_16, %c0_17], %21 {strides = array<i32>} : memref<128x128xbf16, #tpu.memory_space<vmem>>, vector<128x128xbf16>,
    return
  }
  func.func @transform_0(%arg0: i32) -> (i32, i32) {
    %c0_i32 = arith.constant 0 : i32
    %c0_i32_0 = arith.constant 0 : i32
    return %arg0, %c0_i32 : i32, i32
  }
  func.func @transform_1(%arg0: i32) -> (i32, i32) {
    %c0_i32 = arith.constant 0 : i32
    %c0_i32_0 = arith.constant 0 : i32
    return %arg0, %c0_i32 : i32, i32
  }
  func.func @transform_2(%arg0: i32) -> (i32, i32, i32) {
    %c0_i32 = arith.constant 0 : i32
    %c0_i32_0 = arith.constant 0 : i32
    %c0_i32_1 = arith.constant 0 : i32
    %c0_i32_2 = arith.constant 0 : i32
    return %c0_i32, %c0_i32_0, %c0_i32_1 : i32, i32, i32
  }
  func.func @transform_3(%arg0: i32) -> (i32, i32) {
    %c0_i32 = arith.constant 0 : i32
    %c0_i32_0 = arith.constant 0 : i32
    return %arg0, %c0_i32 : i32, i32
  }
}

</mosaic_0001>

<bundles_post_ra>
// kernel: tpu_custom_call.1
= control target key start
LH: loop header
LB: loop body
LE: loop exit
PB: predicated region body
PF: predicated region fallthrough
CT: control target
= control target key end

     0   :  { %8 = vsyncpa [#allocation3], 0  ;;  %s2124_s0 = inlined_call_operand.vmem [shape: bf16[512,128], index: 0, kind: input, shape index: {}]   ;;  %s2125_s1 = inlined_call_operand.vmem [shape: f32[512,3], index: 1, kind: input, shape index: {}]   ;;  %s2126_s2 = inlined_call_operand.vmem [shape: bf16[3,128,128], index: 2, kind: input, shape index: {}]   ;;  %s2127_s3 = inlined_call_operand.hbm [shape: bf16[512,128], index: 3, kind: output, shape index: {}]  }
   0x1   :  { %10 = vsyncpa [#allocation3 + $0x1], 0  ;;  %s1706_s12 = smov 0   ;;  %s1708_s13 = smov 0  }
   0x2   :  { %s1710_s14 = smov 0   ;;  %s1712_s15 = smov 0  }
   0x3 LB: > { %s1727_s16 = sadd.s32 4294967295, %s1678_s15   ;;  %s1216_s17 = sadd.s32 4294967294, %s1678_s15   ;;  %s1678_s15 = sphi %s1712_s15, %s2133_s15   ;;  %s1674_s14 = sphi %s1710_s14, %s2132_s14   ;;  %s1670_s13 = sphi %s1708_s13, %s2131_s13   ;;  %s1666_s12 = sphi %s1706_s12, %s2130_s12  }
   0x4   : > { %s1731_s18 = sadd.s32 1, %s1678_s15   ;;  %s96_s19 = sadd.s32 1, %s1674_s14 }
   0x5   : > { %s93_s20 = ssub.s32 %s1678_s15, %s1731_s18  ;;  %p106_p0 = scmp.ne.s32.totalorder %s1674_s14, %s1670_s13 }
   0x6   : > { %p94_p1 = scmp.eq.s32.totalorder %s93_s20, 0  ;;  %p107_p2 = scmp.eq.s32.totalorder %s1727_s16, 3 }
   0x7   : > { %p112_p3 = scmp.ne.s32.totalorder %s1670_s13, %s1666_s12  ;;  %p113_p4 = scmp.eq.s32.totalorder %s1216_s17, 3 }
   0x8   : > { %s1742_s21 = scalar_select %p94_p1, %s1674_s14, %s96_s19  }
   0x9   : > { %p1744_p5 = por %p107_p2, %p106_p0  ;;  %p1748_p6 = por %p113_p4, %p112_p3 }
   0xa   : > { %p1219_p7 = scmp.ge.s32.totalorder %s1678_s15, 1  ;;  %p152_p8 = scmp.lt.s32.totalorder %s1678_s15, 5 }
   0xc   : > { %p153_p9 = pnand %p1219_p7, %p152_p8 }
   0xd   : > { %v1584_v0 = vld [vmem:[%s2126_s2] sm:$0xff] (!%p153_p9)   ;;  %v1680_v2 = vmov (!%p153_p9), 0   ;;  %s1221_s28 = sshll.u32 (!%p153_p9), %s1727_s16, 4  ;;  %v1586_v3 = vld [vmem:[%s2126_s2 + $0x8] sm:$0xff] (!%p153_p9)   ;;  %v1588_v5 = vld [vmem:[%s2126_s2 + $0x10] sm:$0xff] (!%p153_p9)   ;;  %v1681_v43 = vmov (!%p153_p9), 1  }
   0xe   : > { %156 = sbr.rel (%p153_p9) target bundleno = 324 (0x144), region = 32  ;;  %v1585_v1 = vld [vmem:[%s2126_s2 + $0x40] sm:$0xff] (!%p153_p9)   ;;  %1579 = vset.pattern.permute.xlu1 (!%p153_p9), %v1680_v2  ;;  %1578 = vset.pattern.permute.xlu0 (!%p153_p9), %v1680_v2  ;;  %p182_p10 = scmp.lt.s32.totalorder (!%p153_p9), %s1221_s28, 63  ;;  %v1587_v4 = vld [vmem:[%s2126_s2 + $0x48] sm:$0xff] (!%p153_p9)   ;;  %v1589_v6 = vld [vmem:[%s2126_s2 + $0x50] sm:$0xff] (!%p153_p9)   ;;  %v1682_v50 = vmov (!%p153_p9), 2  }
   0xf   : > { %1422 = vmatprep.subr.bf16.mxu0 (!%p153_p9), %v1584_v0  ;;  %1454 = vmatprep.subr.bf16.mxu1 (!%p153_p9), %v1585_v1  ;;  %v1590_v7 = vld [vmem:[%s2126_s2 + $0x18] sm:$0xff] (!%p153_p9)   ;;  %v1592_v9 = vld [vmem:[%s2126_s2 + $0x20] sm:$0xff] (!%p153_p9)   ;;  %v1594_v11 = vld [vmem:[%s2126_s2 + $0x28] sm:$0xff] (!%p153_p9)   ;;  %s1326_s4 = sshll.u32 (!%p153_p9), %s1727_s16, 10  ;;  %s1683_s11 = smov (!%p153_p9), [#allocation2]  }
  0x10   : > { %1423 = vmatpush3.bf16.msra.mxu0 (!%p153_p9), %v1584_v0  ;;  %1455 = vmatpush3.bf16.msra.mxu1 (!%p153_p9), %v1585_v1  ;;  %v1591_v8 = vld [vmem:[%s2126_s2 + $0x58] sm:$0xff] (!%p153_p9)   ;;  %v1593_v10 = vld [vmem:[%s2126_s2 + $0x60] sm:$0xff] (!%p153_p9)   ;;  %v1595_v12 = vld [vmem:[%s2126_s2 + $0x68] sm:$0xff] (!%p153_p9)   ;;  %s2073_s8 = scalar_lea.hbm (!%p153_p9), %s2127_s3, %s1326_s4  ;;  %s1620_s17 = sshll.u32 (!%p153_p9), %s1683_s11, 4  ;;  %s1621_s17 = int_to_ptr.vmem [resolvable:$false] %s1620_s17 }
  0x11   : > { %1424 = vmatprep.subr.bf16.mxu0 (!%p153_p9), %v1586_v3  ;;  %1456 = vmatprep.subr.bf16.mxu1 (!%p153_p9), %v1587_v4  ;;  %v1596_v16 = vld [vmem:[%s2126_s2 + $0x30] sm:$0xff] (!%p153_p9)   ;;  %v1598_v19 = vld [vmem:[%s2126_s2 + $0x38] sm:$0xff] (!%p153_p9)   ;;  %v1602_v24 = vld [vmem:[%s2126_s2 + $0x80] sm:$0xff] (!%p153_p9)   ;;  %s1622_s19 = scalar_lea.vmem (!%p153_p9), %s1621_s17, 2048 }
  0x12   : > { %v1597_v17 = vld [vmem:[%s2126_s2 + $0x70] sm:$0xff] (!%p153_p9)   ;;  %v1599_v21 = vld [vmem:[%s2126_s2 + $0x78] sm:$0xff] (!%p153_p9)   ;;  %v1603_v28 = vld [vmem:[%s2126_s2 + $0x88] sm:$0xff] (!%p153_p9)  }
  0x13   : > { %v1606_v31 = vld [vmem:[%s2126_s2 + $0x90] sm:$0xff] (!%p153_p9)   ;;  %v1607_v35 = vld [vmem:[%s2126_s2 + $0x98] sm:$0xff] (!%p153_p9)   ;;  %v1610_v38 = vld [vmem:[%s2126_s2 + $0xa0] sm:$0xff] (!%p153_p9)  }
  0x14   : > { %1425 = vmatpush3.bf16.msra.mxu0 (!%p153_p9), %v1586_v3  ;;  %1457 = vmatpush3.bf16.msra.mxu1 (!%p153_p9), %v1587_v4  ;;  %v1611_v41 = vld [vmem:[%s2126_s2 + $0xa8] sm:$0xff] (!%p153_p9)   ;;  %v1614_v45 = vld [vmem:[%s2126_s2 + $0xb0] sm:$0xff] (!%p153_p9)   ;;  %v1615_v48 = vld [vmem:[%s2126_s2 + $0xb8] sm:$0xff] (!%p153_p9)  }
  0x15   : > { %s2135_s28 = smov (!%p182_p10, %s1221_s28), 63  ;;  %1426 = vmatprep.subr.bf16.mxu0 %v1588_v5  ;;  %1458 = vmatprep.subr.bf16.mxu1 %v1589_v6 }
  0x16   : > { %s1224_s20 = sshll.u32 %s2135_s28, 3  ;;  %s1222_s24 = sshll.u32 %s2135_s28, 2 }
  0x17   : > { %s1788_s5 = scalar_lea.vmem %s2125_s1, %s1224_s20  ;;  %s1796_s9 = scalar_lea.vmem %s2124_s0, %s1222_s24 }
  0x18   : > { %1427 = vmatpush3.bf16.msra.mxu0 %v1588_v5  ;;  %1459 = vmatpush3.bf16.msra.mxu1 %v1589_v6  ;;  %v1802_v13 = vld [vmem:[%s1788_s5 + $0x10] sm:$0xff]  ;;  %v1806_v14 = vld [vmem:[%s1796_s9] sm:$0xff]   ;;  %v1810_v15 = vld [vmem:[%s1788_s5 + $0x18] sm:$0xff] }
  0x19   : > { %1428 = vmatprep.subr.bf16.mxu0 %v1590_v7  ;;  %1460 = vmatprep.subr.bf16.mxu1 %v1591_v8  ;;  %v1821_v18 = vld [vmem:[%s1788_s5 + $0x28] sm:$0xff]  ;;  %v1827_v20 = vld [vmem:[%s1788_s5] sm:$0xff]  ;;  %v1838_v23 = vld [vmem:[%s1788_s5 + $0x38] sm:$0xff] }
  0x1a   : > { %448 = vperm.xlu1 %1579, %v1802_v13   ;;  %1438 = vmatprep.mubr.bf16.mxu0 %v1806_v14  ;;  %v1835_v22 = vld [vmem:[%s1788_s5 + $0x8] sm:$0xff]  ;;  %v1849_v26 = vld [vmem:[%s1788_s5 + $0x20] sm:$0xff]  ;;  %v1858_v29 = vld [vmem:[%s1796_s9 + $0x10] sm:$0xff]  }
  0x1b   : > { %1470 = vmatprep.mubr.bf16.mxu1 %v1806_v14  ;;  %438 = vperm.xlu0 %1578, %v1827_v20   ;;  %v1844_v25 = vld [vmem:[%s1796_s9 + $0x8] sm:$0xff]   ;;  %v1865_v30 = vld [vmem:[%s1788_s5 + $0x58] sm:$0xff]  ;;  %v1871_v32 = vld [vmem:[%s1788_s5 + $0x30] sm:$0xff] }
  0x1c   : > { %1429 = vmatpush3.bf16.msra.mxu0 %v1590_v7  ;;  %1461 = vmatpush3.bf16.msra.mxu1 %v1591_v8  ;;  %v1852_v27 = vld [vmem:[%s1788_s5 + $0x48] sm:$0xff]  ;;  %v1876_v33 = vld [vmem:[%s1796_s9 + $0x18] sm:$0xff]   ;;  %v1608_v36 = vld [vmem:[%s1796_s9 + $0x20] sm:$0xff]  }
  0x1d   : > { %1430 = vmatprep.subr.bf16.mxu0 %v1592_v9  ;;  %1462 = vmatprep.subr.bf16.mxu1 %v1593_v10  ;;  %v1880_v34 = vld [vmem:[%s1788_s5 + $0x68] sm:$0xff]  ;;  %v1891_v37 = vld [vmem:[%s1788_s5 + $0x78] sm:$0xff]  ;;  %v1897_v39 = vld [vmem:[%s1788_s5 + $0x40] sm:$0xff] }
  0x1e   : > { %453 = vperm.xlu1 %1579, %v1810_v15   ;;  %v1609_v40 = vld [vmem:[%s1796_s9 + $0x28] sm:$0xff]   ;;  %v1612_v42 = vld [vmem:[%s1796_s9 + $0x30] sm:$0xff]   ;;  %v1613_v46 = vld [vmem:[%s1796_s9 + $0x38] sm:$0xff]  }
  0x1f   : > { %443 = vperm.xlu0 %1578, %v1835_v22   ;;  %v1907_v44 = vld [vmem:[%s1788_s5 + $0x50] sm:$0xff]  ;;  %v223_v47 = vld [vmem:[%s1788_s5 + $0x60] sm:$0xff] }
  0x20   : > { %1431 = vmatpush3.bf16.msra.mxu0 %v1592_v9  ;;  %1463 = vmatpush3.bf16.msra.mxu1 %v1593_v10  ;;  %v225_v49 = vld [vmem:[%s1788_s5 + $0x70] sm:$0xff]  ;;  %s178_s5 = sand.u32 1, %s1670_s13  }
  0x21   : > { %1432 = vmatprep.subr.bf16.mxu0 %v1594_v11  ;;  %1464 = vmatprep.subr.bf16.mxu1 %v1595_v12  ;;  %s1220_s9 = sshll.u32 %s178_s5, 6  ;;  %s2083_s16 = scalar_lea.sflag [#allocation3], %s178_s5 }
  0x22   : > { %463 = vperm.xlu1 %1579, %v1821_v18   ;;  %s2052_s30 = scalar_lea.vmem [#allocation2], %s1220_s9 }
  0x23   : > { %458 = vperm.xlu0 %1578, %v1849_v26   ;;  %s1142_s6 = sshll.u32 %s2052_s30, 4  ;;  %s2075_s6 = int_to_ptr.vmem [resolvable:$true] %s1142_s6 }
  0x24   : > { %1433 = vmatpush3.bf16.msra.mxu0 %v1594_v11  ;;  %1465 = vmatpush3.bf16.msra.mxu1 %v1595_v12  ;;  %s1616_s10 = scalar_lea.vmem %s2075_s6, 1024  ;;  %p1623_p0 = scmp.lt.s32.totalorder %s2075_s6, %s1621_s17 }
  0x25   : > { %1434 = vmatprep.subr.bf16.mxu0 %v1596_v16  ;;  %1466 = vmatprep.subr.bf16.mxu1 %v1597_v17  ;;  %p1617_p11 = scmp.ne.s32.totalorder %s2075_s6, %s1616_s10  ;;  %p1624_p1 = scmp.lt.s32.totalorder %s1622_s19, %s1616_s10 }
  0x26   : > { %473 = vperm.xlu1 %1579, %v1838_v23  }
  0x27   : > { %468 = vperm.xlu0 %1578, %v1871_v32   ;;  %p1618_p12 = pnand %p1617_p11, %p1744_p5  ;;  %p1625_p2 = por %p1624_p1, %p1623_p0 }
  0x28   : > { %1435 = vmatpush3.bf16.msra.mxu0 %v1596_v16  ;;  %1467 = vmatpush3.bf16.msra.mxu1 %v1597_v17 }
  0x29   : > { %1436 = vmatprep.subr.bf16.mxu0 %v1598_v19  ;;  %1468 = vmatprep.subr.bf16.mxu1 %v1599_v21  ;;  %p1619_p13 = pneg %p1618_p12 }
  0x2a   : > { %483 = vperm.xlu1 %1579, %v1852_v27  }
  0x2b   : > { %478 = vperm.xlu0 %1578, %v1897_v39   ;;  %p1626_p3 = pnand %p1625_p2, %p1619_p13 }
  0x2c   : > { %1437 = vmatpush3.bf16.msra.mxu0 %v1598_v19  ;;  %1469 = vmatpush3.bf16.msra.mxu1 %v1599_v21 }
  0x2d   : > { %1486 = vmatprep.subr.bf16.mxu0 %v1602_v24  ;;  %1518 = vmatprep.subr.bf16.mxu1 %v1602_v24 }
  0x2e   : > { %493 = vperm.xlu1 %1579, %v1865_v30  }
  0x2f   : > { %1439 = vmatmul.mubr.bf16.vlgmr.msra.gmra.mrb[0].mxu0 %v1844_v25  ;;  %1471 = vmatmul.mubr.bf16.vlgmr.msra.gmra.mrb[0].mxu1 %v1844_v25 }
  0x30   : > { %1487 = vmatpush3.bf16.msra.mxu0 %v1602_v24  ;;  %1526 = vmatpush3.bf16.msra.mxu1 %v1602_v24 }
  0x31   : > { %1488 = vmatprep.subr.bf16.mxu0 %v1603_v28  ;;  %1519 = vmatprep.subr.bf16.mxu1 %v1603_v28 }
  0x32   : > { %1442 = vmatprep.mubr.bf16.mxu0 %v1858_v29  ;;  %1474 = vmatprep.mubr.bf16.mxu1 %v1858_v29 }
  0x33   : > { %503 = vperm.xlu1 %1579, %v1880_v34   ;;  %488 = vperm.xlu0 %1578, %v1907_v44  }
  0x34   : > { %1489 = vmatpush3.bf16.msra.mxu0 %v1603_v28  ;;  %1527 = vmatpush3.bf16.msra.mxu1 %v1603_v28 }
  0x35   : > { %1490 = vmatprep.subr.bf16.mxu0 %v1606_v31  ;;  %1520 = vmatprep.subr.bf16.mxu1 %v1606_v31 }
  0x37   : > { %1443 = vmatmul.mubr.bf16.gmra.mrb[4].mxu0 %v1876_v33  ;;  %1475 = vmatmul.mubr.bf16.gmra.mrb[4].mxu1 %v1876_v33 }
  0x38   : > { %1491 = vmatpush3.bf16.msra.mxu0 %v1606_v31  ;;  %1528 = vmatpush3.bf16.msra.mxu1 %v1606_v31 }
  0x39   : > { %1492 = vmatprep.subr.bf16.mxu0 %v1607_v35  ;;  %1521 = vmatprep.subr.bf16.mxu1 %v1607_v35 }
  0x3a   : > { %1446 = vmatprep.mubr.bf16.mxu0 %v1608_v36  ;;  %1478 = vmatprep.mubr.bf16.mxu1 %v1608_v36 }
  0x3b   : > { %513 = vperm.xlu1 %1579, %v1891_v37   ;;  %498 = vperm.xlu0 %1578, %v223_v47  }
  0x3c   : > { %1493 = vmatpush3.bf16.msra.mxu0 %v1607_v35  ;;  %1529 = vmatpush3.bf16.msra.mxu1 %v1607_v35 }
  0x3d   : > { %1494 = vmatprep.subr.bf16.mxu0 %v1610_v38  ;;  %1522 = vmatprep.subr.bf16.mxu1 %v1610_v38 }
  0x3f   : > { %1447 = vmatmul.mubr.bf16.gmra.mrb[8].mxu0 %v1609_v40  ;;  %1581 = vset.pattern.permute.xlu1 %v1681_v43 }
  0x40   : > { %1479 = vmatmul.mubr.bf16.gmra.mrb[8].mxu1 %v1609_v40  ;;  %1495 = vmatpush3.bf16.msra.mxu0 %v1610_v38 }
  0x41   : > { %1530 = vmatpush3.bf16.msra.mxu1 %v1610_v38  ;;  %1496 = vmatprep.subr.bf16.mxu0 %v1611_v41 }
  0x42   : > { %1523 = vmatprep.subr.bf16.mxu1 %v1611_v41  ;;  %1450 = vmatprep.mubr.bf16.mxu0 %v1612_v42 }
  0x43   : > { %1482 = vmatprep.mubr.bf16.mxu1 %v1612_v42  ;;  %699 = vperm.xlu1 %1581, %v1835_v22  }
  0x44   : > { %1497 = vmatpush3.bf16.msra.mxu0 %v1611_v41  ;;  %508 = vperm.xlu0 %1578, %v225_v49  }
  0x45   : > { %1531 = vmatpush3.bf16.msra.mxu1 %v1611_v41  ;;  %1498 = vmatprep.subr.bf16.mxu0 %v1614_v45 }
  0x46   : > { %1524 = vmatprep.subr.bf16.mxu1 %v1614_v45 }
  0x47   : > { %1451 = vmatmul.mubr.bf16.gmra.mrb[12].mxu0 %v1613_v46  ;;  %703 = vperm.xlu1 %1581, %v1802_v13  }
  0x48   : > { %1483 = vmatmul.mubr.bf16.gmra.mrb[12].mxu1 %v1613_v46  ;;  %1499 = vmatpush3.bf16.msra.mxu0 %v1614_v45 }
  0x49   : > { %1532 = vmatpush3.bf16.msra.mxu1 %v1614_v45  ;;  %1500 = vmatprep.subr.bf16.mxu0 %v1615_v48 }
  0x4a   : > { %1525 = vmatprep.subr.bf16.mxu1 %v1615_v48  ;;  %1502 = vmatprep.mubr.bf16.mxu0 %v1806_v14 }
  0x4b   : > { %1510 = vmatprep.mubr.bf16.mxu1 %v1608_v36  ;;  %711 = vperm.xlu1 %1581, %v1849_v26  }
  0x4c   : > { %1501 = vmatpush3.bf16.msra.mxu0 %v1615_v48  ;;  %1580 = vset.pattern.permute.xlu0 %v1681_v43 }
  0x4d   : > { %1533 = vmatpush3.bf16.msra.mxu1 %v1615_v48  ;;  %695 = vperm.xlu0 %1580, %v1827_v20  }
  0x4f   : > { %1503 = vmatmul.mubr.bf16.vlgmr.msra.gmra.mrb[16].mxu0 %v1844_v25  ;;  %719 = vperm.xlu1 %1581, %v1871_v32  }
  0x50   : > { %1511 = vmatmul.mubr.bf16.vlgmr.msra.gmra.mrb[16].mxu1 %v1609_v40  ;;  %1506 = vmatprep.mubr.bf16.mxu0 %v1858_v29 }
  0x51   : > { %1514 = vmatprep.mubr.bf16.mxu1 %v1612_v42  ;;  %707 = vperm.xlu0 %1580, %v1810_v15  }
  0x53   : > { %727 = vperm.xlu1 %1581, %v1897_v39  }
  0x55   : > { %715 = vperm.xlu0 %1580, %v1821_v18  }
  0x57   : > { %1507 = vmatmul.mubr.bf16.gmra.mrb[20].mxu0 %v1876_v33  ;;  %735 = vperm.xlu1 %1581, %v1907_v44  }
  0x58   : > { %1515 = vmatmul.mubr.bf16.gmra.mrb[20].mxu1 %v1613_v46 }
  0x59   : > { %723 = vperm.xlu0 %1580, %v1838_v23  }
  0x5b   : > { %743 = vperm.xlu1 %1581, %v223_v47  }
  0x5d   : > { %731 = vperm.xlu0 %1580, %v1852_v27  }
  0x5f   : > { %751 = vperm.xlu1 %1581, %v225_v49  }
  0x61   : > { %739 = vperm.xlu0 %1580, %v1865_v30  }
  0x63   : > { %1582 = vset.pattern.permute.xlu1 %v1682_v50 }
  0x64   : > { %953 = vperm.xlu1 %1582, %v1827_v20  }
  0x65   : > { %747 = vperm.xlu0 %1580, %v1880_v34  }
  0x68   : > { %961 = vperm.xlu1 %1582, %v1802_v13  }
  0x69   : > { %755 = vperm.xlu0 %1580, %v1891_v37  }
  0x6c   : > { %965 = vperm.xlu1 %1582, %v1810_v15  }
  0x6d   : > { %1583 = vset.pattern.permute.xlu0 %v1682_v50 }
  0x6e   : > { %957 = vperm.xlu0 %1583, %v1835_v22  }
  0x70   : > { %973 = vperm.xlu1 %1582, %v1821_v18  }
  0x72   : > { %969 = vperm.xlu0 %1583, %v1849_v26  }
  0x74   : > { %981 = vperm.xlu1 %1582, %v1838_v23  }
  0x76   : > { %977 = vperm.xlu0 %1583, %v1871_v32  }
  0x78   : > { %989 = vperm.xlu1 %1582, %v1852_v27  }
  0x7a   : > { %985 = vperm.xlu0 %1583, %v1897_v39  }
  0x7c   : > { %997 = vperm.xlu1 %1582, %v1865_v30  }
  0x7e   : > { %993 = vperm.xlu0 %1583, %v1907_v44  }
  0x80   : > { %1005 = vperm.xlu1 %1582, %v1880_v34  }
  0x82   : > { %1001 = vperm.xlu0 %1583, %v223_v47  }
  0x84   : > { %1013 = vperm.xlu1 %1582, %v1891_v37  }
  0x86   : > { %1009 = vperm.xlu0 %1583, %v225_v49  }
  0x99   : > { %v449_v51 = vpop.permute.xlu1 %448 }
  0x9a   : > { %v439_v53 = vpop.permute.xlu0 %438 }
  0x9d   : > { %v454_v52 = vpop.permute.xlu1 %453 }
  0x9e   : > { %v444_v56 = vpop.permute.xlu0 %443 }
  0xa1   : > { %v1951_v54 = vpop.permute.xlu1 %463 }
  0xa2   : > { %v459_v58 = vpop.permute.xlu0 %458 }
  0xa5   : > { %v1953_v55 = vpop.permute.xlu1 %473 }
  0xa6   : > { %v469_v60 = vpop.permute.xlu0 %468 }
  0xa9   : > { %v1955_v57 = vpop.permute.xlu1 %483 }
  0xaa   : > { %v1961_v62 = vpop.permute.xlu0 %478 }
  0xad   : > { %v1957_v59 = vpop.permute.xlu1 %493 }
  0xb2   : > { %v1959_v61 = vpop.permute.xlu1 %503  ;;  %v1965_v0 = vpop.permute.xlu0 %488 }
  0xba   : > { %v1963_v63 = vpop.permute.xlu1 %513  ;;  %v1967_v2 = vpop.permute.xlu0 %498 }
  0xc2   : > { %v700_v1 = vpop.permute.xlu1 %699 }
  0xc3   : > { %v1969_v4 = vpop.permute.xlu0 %508 }
  0xc6   : > { %v704_v3 = vpop.permute.xlu1 %703 }
  0xca   : > { %v712_v5 = vpop.permute.xlu1 %711 }
  0xcc   : > { %v696_v6 = vpop.permute.xlu0 %695 }
  0xce   : > { %v720_v7 = vpop.permute.xlu1 %719 }
  0xd0   : > { %v708_v8 = vpop.permute.xlu0 %707 }
  0xd2   : > { %v1971_v9 = vpop.permute.xlu1 %727 }
  0xd4   : > { %v716_v10 = vpop.permute.xlu0 %715 }
  0xd6   : > { %v736_v11 = vpop.permute.xlu1 %735 }
  0xd8   : > { %v724_v12 = vpop.permute.xlu0 %723 }
  0xda   : > { %v1973_v13 = vpop.permute.xlu1 %743 }
  0xdc   : > { %v1975_v14 = vpop.permute.xlu0 %731 }
  0xde   : > { %v1977_v15 = vpop.permute.xlu1 %751 }
  0xe0   : > { %v1979_v16 = vpop.permute.xlu0 %739 }
  0xe3   : > { %v1981_v17 = vpop.permute.xlu1 %953 }
  0xe4   : > { %v1983_v18 = vpop.permute.xlu0 %747 }
  0xe7   : > { %v1985_v19 = vpop.permute.xlu1 %961 }
  0xe8   : > { %v1987_v20 = vpop.permute.xlu0 %755 }
  0xeb   : > { %v1989_v21 = vpop.permute.xlu1 %965 }
  0xed   : > { %v1991_v22 = vpop.permute.xlu0 %957 }
  0xef   : > { %v1993_v23 = vpop.permute.xlu1 %973 }
  0xf1   : > { %v1995_v24 = vpop.permute.xlu0 %969 }
  0xf3   : > { %v2003_v44 = vpop.permute.xlu1 %981 }
  0xf5   : > { %v2007_v46 = vpop.permute.xlu0 %977 }
 0x102   : > { %v1440_v25 = vpop.f32.mrb[0].mxu0  ;;  %v1472_v27 = vpop.f32.mrb[0].mxu1 }
 0x103   : > { %v518_v26 = vmul.f32 %v1440_v25, %v449_v51  ;;  %v373_v28 = vpop.f32.mrb[1].mxu0  ;;  %v760_v29 = vmul.f32 %v1472_v27, %v704_v3  ;;  %v631_v31 = vpop.f32.mrb[1].mxu1 }
 0x104   : > { %v516_v30 = vmul.f32 %v439_v53, %v373_v28  ;;  %v1441_v32 = vpop.f32.mrb[2].mxu0  ;;  %v758_v33 = vmul.f32 %v696_v6, %v631_v31  ;;  %v1473_v35 = vpop.f32.mrb[2].mxu1 }
 0x105   : > { %v519_v34 = vmul.f32 %v1441_v32, %v454_v52  ;;  %v376_v36 = vpop.f32.mrb[3].mxu0  ;;  %v1997_v37 = vadd.f32 %v760_v29, %v518_v26  ;;  %v761_v38 = vmul.f32 %v1473_v35, %v708_v8  ;;  %v634_v40 = vpop.f32.mrb[3].mxu1 }
 0x106   : > { %v517_v39 = vmul.f32 %v444_v56, %v376_v36  ;;  %v1999_v41 = vadd.f32 %v758_v33, %v516_v30  ;;  %v759_v42 = vmul.f32 %v700_v1, %v634_v40 }
 0x107   : > { %v2001_v43 = vadd.f32 %v761_v38, %v519_v34 }
 0x108   : > { %v2005_v45 = vadd.f32 %v759_v42, %v517_v39 }
 0x10a   : > { %v1444_v47 = vpop.f32.mrb[4].mxu0  ;;  %v1476_v49 = vpop.f32.mrb[4].mxu1 }
 0x10b   : > { %v522_v48 = vmul.f32 %v1444_v47, %v469_v60  ;;  %v389_v50 = vpop.f32.mrb[5].mxu0  ;;  %v764_v51 = vmul.f32 %v1476_v49, %v720_v7  ;;  %v647_v53 = vpop.f32.mrb[5].mxu1 }
 0x10c   : > { %v520_v52 = vmul.f32 %v459_v58, %v389_v50  ;;  %v1445_v56 = vpop.f32.mrb[6].mxu0  ;;  %v762_v3 = vmul.f32 %v712_v5, %v647_v53  ;;  %v1477_v1 = vpop.f32.mrb[6].mxu1 }
 0x10d   : > { %v523_v6 = vmul.f32 %v1445_v56, %v1953_v55  ;;  %v392_v8 = vpop.f32.mrb[7].mxu0  ;;  %v2010_v25 = vadd.f32 %v764_v51, %v522_v48  ;;  %v765_v26 = vmul.f32 %v1477_v1, %v724_v12  ;;  %v650_v28 = vpop.f32.mrb[7].mxu1 }
 0x10e   : > { %v521_v27 = vmul.f32 %v1951_v54, %v392_v8  ;;  %v2013_v29 = vadd.f32 %v762_v3, %v520_v52  ;;  %v763_v60 = vmul.f32 %v716_v10, %v650_v28  ;;  %v2017_v7 = vpop.permute.xlu1 %989  ;;  %v986_v5 = vpop.permute.xlu0 %985 }
 0x10f   : > { %v2015_v30 = vadd.f32 %v765_v26, %v523_v6 }
 0x110   : > { %v2019_v58 = vadd.f32 %v763_v60, %v521_v27 }
 0x112   : > { %v1448_v31 = vpop.f32.mrb[8].mxu0  ;;  %v998_v50 = vpop.permute.xlu1 %997 }
 0x113   : > { %v526_v55 = vmul.f32 %v1448_v31, %v1965_v0  ;;  %v1480_v32 = vpop.f32.mrb[8].mxu1  ;;  %v405_v33 = vpop.f32.mrb[9].mxu0 }
 0x114   : > { %v768_v34 = vmul.f32 %v1480_v32, %v736_v11  ;;  %v524_v12 = vmul.f32 %v1961_v62, %v405_v33  ;;  %v663_v54 = vpop.f32.mrb[9].mxu1  ;;  %v1449_v35 = vpop.f32.mrb[10].mxu0 }
 0x115   : > { %v766_v36 = vmul.f32 %v1971_v9, %v663_v54  ;;  %v527_v10 = vmul.f32 %v1449_v35, %v1957_v59  ;;  %v1481_v38 = vpop.f32.mrb[10].mxu1  ;;  %v408_v39 = vpop.f32.mrb[11].mxu0 }
 0x116   : > { %v784_v40 = vadd.f32 %v768_v34, %v526_v55  ;;  %v769_v42 = vmul.f32 %v1481_v38, %v1979_v16  ;;  %v525_v47 = vmul.f32 %v1955_v57, %v408_v39  ;;  %v666_v48 = vpop.f32.mrb[11].mxu1  ;;  %v994_v51 = vpop.permute.xlu0 %993 }
 0x117   : > { %v782_v0 = vadd.f32 %v766_v36, %v524_v12  ;;  %v767_v49 = vmul.f32 %v1975_v14, %v666_v48  ;;  %v1006_v31 = vpop.permute.xlu1 %1005 }
 0x118   : > { %v785_v11 = vadd.f32 %v769_v42, %v527_v10 }
 0x119   : > { %v783_v62 = vadd.f32 %v767_v49, %v525_v47 }
 0x11a   : > { %v1452_v52 = vpop.f32.mrb[12].mxu0 }
 0x11b   : > { %v530_v9 = vmul.f32 %v1452_v52, %v1969_v4  ;;  %v1484_v53 = vpop.f32.mrb[12].mxu1  ;;  %v421_v59 = vpop.f32.mrb[13].mxu0 }
 0x11c   : > { %v772_v56 = vmul.f32 %v1484_v53, %v1977_v15  ;;  %v528_v3 = vmul.f32 %v1967_v2, %v421_v59  ;;  %v679_v16 = vpop.f32.mrb[13].mxu1  ;;  %v1453_v6 = vpop.f32.mrb[14].mxu0 }
 0x11d   : > { %v770_v57 = vmul.f32 %v1973_v13, %v679_v16  ;;  %v531_v14 = vmul.f32 %v1453_v6, %v1963_v63  ;;  %v1485_v1 = vpop.f32.mrb[14].mxu1  ;;  %v424_v8 = vpop.f32.mrb[15].mxu0 }
 0x11e   : > { %v788_v26 = vadd.f32 %v772_v56, %v530_v9  ;;  %v773_v27 = vmul.f32 %v1485_v1, %v1987_v20  ;;  %v529_v4 = vmul.f32 %v1959_v61, %v424_v8  ;;  %v682_v28 = vpop.f32.mrb[15].mxu1  ;;  %v1002_v13 = vpop.permute.xlu0 %1001 }
 0x11f   : > { %v786_v60 = vadd.f32 %v770_v57, %v528_v3  ;;  %v771_v15 = vmul.f32 %v1983_v18, %v682_v28  ;;  %v1014_v52 = vpop.permute.xlu1 %1013 }
 0x120   : > { %v2036_v2 = vadd.f32 %v773_v27, %v531_v14 }
 0x121   : > { %v2038_v55 = vadd.f32 %v771_v15, %v529_v4 }
 0x122   : > { %v1504_v32 = vpop.f32.mrb[16].mxu0  ;;  %v1010_v53 = vpop.permute.xlu0 %1009 }
 0x123   : > { %v1018_v63 = vmul.f32 %v1504_v32, %v1985_v19  ;;  %v1512_v33 = vpop.f32.mrb[16].mxu1  ;;  %v889_v34 = vpop.f32.mrb[17].mxu0 }
 0x124   : > { %v1026_v20 = vmul.f32 %v1512_v33, %v994_v51  ;;  %v1016_v61 = vmul.f32 %v1981_v17, %v889_v34  ;;  %v921_v12 = vpop.f32.mrb[17].mxu1  ;;  %v1505_v54 = vpop.f32.mrb[18].mxu0 }
 0x125   : > { %v1034_v18 = vadd.f32 %v1018_v63, %v1997_v37  ;;  %v1024_v35 = vmul.f32 %v986_v5, %v921_v12  ;;  %v1019_v36 = vmul.f32 %v1505_v54, %v1989_v21  ;;  %v1513_v10 = vpop.f32.mrb[18].mxu1  ;;  %v892_v38 = vpop.f32.mrb[19].mxu0 }
 0x126   : > { %v1042_v39 = vadd.f32 %v1026_v20, %v784_v40  ;;  %v1032_v42 = vadd.f32 %v1016_v61, %v1999_v41  ;;  %v1027_v19 = vmul.f32 %v1513_v10, %v998_v50  ;;  %v1017_v47 = vmul.f32 %v1991_v22, %v892_v38  ;;  %v924_v48 = vpop.f32.mrb[19].mxu1 }
 0x127   : > { %v1040_v49 = vadd.f32 %v1024_v35, %v782_v0  ;;  %v1035_v17 = vadd.f32 %v1019_v36, %v2001_v43  ;;  %v1025_v51 = vmul.f32 %v2017_v7, %v924_v48 }
 0x128   : > { %v1043_v37 = vadd.f32 %v1027_v19, %v785_v11  ;;  %v1033_v5 = vadd.f32 %v1017_v47, %v2005_v45 }
 0x129   : > { %v1335_v9 = vpack.c.bf16 %v1035_v17, %v1034_v18  ;;  %v1041_v21 = vadd.f32 %v1025_v51, %v783_v62 }
 0x12a   : > { %v1355_v59 = vpack.c.bf16 %v1043_v37, %v1042_v39  ;;  %v1330_v40 = vpack.c.bf16 %v1033_v5, %v1032_v42  ;;  %v1508_v56 = vpop.f32.mrb[20].mxu0 }
 0x12b   : > { %1367 = vst [vmem:[%s2052_s30 + $0x8] sm:$0xff] %v1335_v9   ;;  %v1350_v22 = vpack.c.bf16 %v1041_v21, %v1040_v49  ;;  %v1022_v41 = vmul.f32 %v1508_v56, %v2007_v46  ;;  %v1516_v43 = vpop.f32.mrb[20].mxu1  ;;  %v905_v7 = vpop.f32.mrb[21].mxu0 }
 0x12c   : > { %1371 = vst [vmem:[%s2052_s30 + $0x28] sm:$0xff] %v1355_v59   ;;  %1331 = vst [vmem:[%s2052_s30] sm:$0xff] %v1330_v40   ;;  %v1030_v45 = vmul.f32 %v1516_v43, %v1010_v53  ;;  %v1020_v0 = vmul.f32 %v1995_v24, %v905_v7  ;;  %v937_v11 = vpop.f32.mrb[21].mxu1  ;;  %v1509_v50 = vpop.f32.mrb[22].mxu0 }
 0x12d   : > { %1370 = vst [vmem:[%s2052_s30 + $0x20] sm:$0xff] %v1350_v22   ;;  %v1038_v62 = vadd.f32 %v1022_v41, %v2010_v25  ;;  %v1028_v3 = vmul.f32 %v1002_v13, %v937_v11  ;;  %v1023_v16 = vmul.f32 %v1509_v50, %v2003_v44  ;;  %v1517_v6 = vpop.f32.mrb[22].mxu1  ;;  %v908_v57 = vpop.f32.mrb[23].mxu0 }
 0x12e   : > { %v1046_v46 = vadd.f32 %v1030_v45, %v788_v26  ;;  %v1036_v14 = vadd.f32 %v1020_v0, %v2013_v29  ;;  %v1031_v1 = vmul.f32 %v1517_v6, %v1014_v52  ;;  %v1021_v8 = vmul.f32 %v1993_v23, %v908_v57  ;;  %v940_v24 = vpop.f32.mrb[23].mxu1 }
 0x12f   : > { %v1044_v27 = vadd.f32 %v1028_v3, %v786_v60  ;;  %v1039_v4 = vadd.f32 %v1023_v16, %v2015_v30  ;;  %v1029_v25 = vmul.f32 %v1006_v31, %v940_v24 }
 0x130   : > { %v1047_v44 = vadd.f32 %v1031_v1, %v2036_v2  ;;  %v1037_v29 = vadd.f32 %v1021_v8, %v2019_v58 }
 0x131   : > { %v1345_v26 = vpack.c.bf16 %v1039_v4, %v1038_v62  ;;  %v1045_v28 = vadd.f32 %v1029_v25, %v2038_v55 }
 0x132   : > { %v1365_v23 = vpack.c.bf16 %v1047_v44, %v1046_v46  ;;  %v1340_v15 = vpack.c.bf16 %v1037_v29, %v1036_v14 }
 0x133   : > { %1369 = vst [vmem:[%s2052_s30 + $0x18] sm:$0xff] %v1345_v26   ;;  %v1360_v30 = vpack.c.bf16 %v1045_v28, %v1044_v27 }
 0x134   : > { %1373 = vst [vmem:[%s2052_s30 + $0x38] sm:$0xff] %v1365_v23   ;;  %1368 = vst [vmem:[%s2052_s30 + $0x10] sm:$0xff] %v1340_v15  }
 0x135   : > { %1372 = vst [vmem:[%s2052_s30 + $0x30] sm:$0xff] %v1360_v30  }
 0x136   : > { %1629 = shalt.err (!%p1626_p3)
}
 0x137   : > { %s1630_s20 = scalar_lea.hbm %s2073_s8, 1024  ;;  %s1634_s26 = scalar_lea.hbm %s2127_s3, 4096 }
 0x138   : > { %p1631_p4 = scmp.ne.s32.totalorder %s2073_s8, %s1630_s20  ;;  %p1635_p9 = scmp.lt.u32.totalorder %s2073_s8, %s2127_s3 }
 0x139   : > { %p1636_p10 = scmp.lt.u32.totalorder %s1634_s26, %s1630_s20  ;;  %p1638_p12 = scmp.lt.u32.totalorder %s1630_s20, %s2073_s8 }
 0x13a   : > { %p1632_p7 = pnand %p1631_p4, %p1744_p5 }
 0x13b   : > { %p1637_p11 = por %p1636_p10, %p1635_p9 }
 0x13c   : > { %p1633_p8 = pneg %p1632_p7 }
 0x13d   : > { %p1639_p13 = por %p1638_p12, %p1637_p11 }
 0x13f   : > { %p1640_p0 = pnand %p1639_p13, %p1633_p8 }
 0x141   : > { %1643 = shalt.err (!%p1640_p0)
}
 0x142   : > { %s1684_s5 = smov 64   ;;  %s1685_s9 = smov 4  }
 0x143   : > { %1534 = dma.vmem_to_hbm [thread:$0]  (%p1744_p5), %s2075_s6, 1024, %s2073_s8, %s2083_s16, %s1684_s5, %s1684_s5, %s1685_s9  }
 0x144 PF: > { %p1540_p1 = scmp.ge.s32.totalorder %s1678_s15, 2  ;;  %s1157_s30 = sand.u32 1, %s1666_s12  }
 0x145   : > { %s1158_s4 = scalar_lea.sflag [#allocation3], %s1157_s30 }
 0x146   : > { %p1537_p2 = pnand %p1540_p1, %p1748_p6 }
 0x148   : > { %1661 = dma.done.wait (!%p1537_p2), %s1158_s4, 1024  }
 0x149   : > { %1663 = vsyncadd (!%p1537_p2), %s1158_s4, 4294966272  ;;  %p13_p3 = scmp.ge.s32.totalorder %s1731_s18, 6   ;;  %s2130_s12 = smov %s1670_s13 }
 0x14a   : > { %s2131_s13 = smov %s1674_s14  ;;  %s2132_s14 = smov %s1742_s21 }
 0x14b   : > { %s2133_s15 = smov %s1731_s18  ;;  %15 = sbr.rel (!%p13_p3) target bundleno = 3 (0x3), region = 72 }
 0x152   :  { %1163 = vsyncpa [#allocation3], 1 }
 0x153   :  { %1165 = vsyncpa [#allocation3 + $0x1], 1 }

</bundles_post_ra>
